<compile_context>
chip_gen: v6e
topology: v6e:2x2x1
jax: 0.10.0
libtpu: 0.0.40
codegen_flags: <defaults>
</compile_context>

<pallas_src>
import functools

import jax
import jax.numpy as jnp
from jax.experimental import pallas as pl
from jax.experimental.pallas import tpu as pltpu


def _kl_div_with_logits_kernel(x_ref, y_ref, o_ref, *, n_rows, tile_n, need_mask):
    i = pl.program_id(0)

    x = x_ref[...].astype(jnp.float32)
    y = y_ref[...].astype(jnp.float32)

    # log_softmax(x) pieces: only per-row log-normalizer is needed explicitly.
    x_sh = x - jnp.max(x, axis=1, keepdims=True)
    log_sx = jnp.log(jnp.sum(jnp.exp(x_sh), axis=1, keepdims=True))

    # softmax(y) pieces with the per-row normalizer kept factored out.
    y_sh = y - jnp.max(y, axis=1, keepdims=True)
    ey = jnp.exp(y_sh)
    sy = jnp.sum(ey, axis=1, keepdims=True)
    log_sy = jnp.log(sy)

    # Per-row reciprocal on the EUP slot + one Newton refinement step:
    # replaces an N*C element-wise divide with N per-row ops.
    inv_sy = pl.reciprocal(sy, approx=True)
    inv_sy = inv_sy * (2.0 - sy * inv_sy)

    # sum_c q*(log q - log_p)
    #   = inv_sy * sum_c ey*(y_sh - x_sh) + (log_sx - log_sy)
    # (ey == 0 terms vanish, matching PyTorch's 0*log(0) = 0 rule.)
    inner = jnp.sum(ey * (y_sh - x_sh), axis=1, keepdims=True)
    row_kl = inv_sy * inner + (log_sx - log_sy)              # (tile_n, 1)

    if need_mask:
        # Mask rows past N (garbage rows of a partial last tile). Emitted only
        # when N % tile_n != 0 (static specialization).
        row_ids = i * tile_n + jax.lax.broadcasted_iota(jnp.int32, row_kl.shape, 0)
        row_kl = jnp.where(row_ids < n_rows, row_kl, 0.0)

    # Independent per-tile partial sum -> lane-dense (8, 128) output slot.
    # No resident accumulator: grid axis can be "parallel" (v7x 2nd TC).
    partial = jnp.sum(row_kl)
    o_ref[...] = jnp.full(o_ref.shape, partial, dtype=jnp.float32)


def _vmem_capacity_bytes():
    # Trace-time hardware query; conservative (v7x-sized) fallback.
    try:
        return int(pltpu.get_tpu_info().vmem_capacity_bytes)
    except Exception:
        return 64 * 1024 * 1024


def _choose_tile_n(n, c, in_itemsize, vmem_budget_bytes):
    # Budget covers: 2 inputs x 2 pipeline buffers x (tile_n, C) at the input
    # itemsize, plus ~5 live f32 (tile_n, C) temporaries inside the body.
    bytes_per_row = c * (4 * in_itemsize + 20)
    t = max(1, vmem_budget_bytes // bytes_per_row)
    # Round to the dtype's sublane packing: 8 for f32, 16 for bf16, 32 for int8.
    pack = max(8, 32 // in_itemsize)
    t = max(pack, (t // pack) * pack)
    n_pad = ((n + pack - 1) // pack) * pack
    return max(pack, min(t, n_pad))


def kl_div_with_logits(x, y, *, tile_n=None):
    """Pallas equivalent of KLDivWithLogits.forward(x, y). x, y: (N, C) logits."""
    assert x.shape == y.shape and x.ndim == 2
    n, c = x.shape
    itemsize = jnp.dtype(x.dtype).itemsize

    cap = _vmem_capacity_bytes()
    # ~96 MiB on 128-MiB parts (v5e/v6e), ~48 MiB on 64-MiB parts (v7x).
    vmem_limit = min(cap * 3 // 4, 100 * 1024 * 1024)
    if tile_n is None:
        tile_n = _choose_tile_n(n, c, itemsize, (vmem_limit * 4) // 5)

    num_tiles = pl.cdiv(n, tile_n)
    need_mask = (n % tile_n) != 0

    kernel = functools.partial(
        _kl_div_with_logits_kernel, n_rows=n, tile_n=tile_n, need_mask=need_mask
    )
    out = pl.pallas_call(
        kernel,
        # One aligned (8, 128) slot per grid step (lane-dense, unmasked store).
        out_shape=jax.ShapeDtypeStruct((8, num_tiles * 128), jnp.float32),
        grid_spec=pltpu.PrefetchScalarGridSpec(
            num_scalar_prefetch=0,
            grid=(num_tiles,),
            in_specs=[
                pl.BlockSpec((tile_n, c), lambda i: (i, 0)),
                pl.BlockSpec((tile_n, c), lambda i: (i, 0)),
            ],
            out_specs=pl.BlockSpec((8, 128), lambda i: (0, i)),
        ),
        compiler_params=pltpu.CompilerParams(
            # Tiles are independent partial sums -> shardable across TCs (v7x).
            dimension_semantics=("parallel",),
            vmem_limit_bytes=int(vmem_limit),
        ),
    )(x, y)

    # Final (tiny) reduction + divide-by-N in the wrapper.
    partials = out[0, :].reshape(num_tiles, 128)[:, 0]
    return jnp.sum(partials) / n


def _reference(x, y):
    # Pure-JAX reference for the correctness check.
    xf = x.astype(jnp.float32)
    yf = y.astype(jnp.float32)
    log_p = jax.nn.log_softmax(xf, axis=1)
    q = jax.nn.softmax(yf, axis=1)
    log_q = jax.nn.log_softmax(yf, axis=1)
    elem = jnp.where(q > 0.0, q * (log_q - log_p), 0.0)
    return jnp.sum(elem) / x.shape[0]


if __name__ == "__main__":
    key = jax.random.PRNGKey(0)
    kx, ky = jax.random.split(key)
    # Small shapes: C lane-aligned to 128; N chosen so forced small tiles
    # exercise the multi-step grid and the partial-last-tile row mask.
    N, C = 20, 128
    x = jax.random.normal(kx, (N, C), dtype=jnp.float32)
    y = jax.random.normal(ky, (N, C), dtype=jnp.float32)

    ref = jax.block_until_ready(_reference(x, y))

    # 1) default (auto-sized) tile: single grid step, no mask.
    loss = jax.block_until_ready(kl_div_with_logits(x, y))
    assert jnp.allclose(loss, ref, rtol=5e-4, atol=5e-4), (loss, ref)

    # 2) forced multi-tile path: 3 grid steps, last tile partially masked.
    loss_t = jax.block_until_ready(kl_div_with_logits(x, y, tile_n=8))
    assert jnp.allclose(loss_t, ref, rtol=5e-4, atol=5e-4), (loss_t, ref)

    # 3) bf16 inputs (halves HBM traffic; compute stays f32 in-kernel).
    #    tile_n=16 matches bf16 sublane packing; 2 tiles, last one masked.
    xb, yb = x.astype(jnp.bfloat16), y.astype(jnp.bfloat16)
    ref_b = jax.block_until_ready(_reference(xb, yb))
    loss_b = jax.block_until_ready(kl_div_with_logits(xb, yb, tile_n=16))
    assert jnp.allclose(loss_b, ref_b, rtol=5e-4, atol=5e-4), (loss_b, ref_b)

    print("KERNEL_OK")
</pallas_src>

<mosaic_0001>
module attributes {stable_mosaic.version = 11 : i64} {
  func.func @_kl_div_with_logits_kernel(%arg0: i32, %arg1: memref<24x128xf32, #tpu.memory_space<vmem>>, %arg2: memref<24x128xf32, #tpu.memory_space<vmem>>, %arg3: memref<8x128xf32, #tpu.memory_space<vmem>>) attributes {dimension_semantics = [#tpu.dimension_semantics<parallel>], iteration_bounds = array<i64: 1>, scalar_prefetch = 0 : i64, scratch_operands = 0 : i64, tpu.core_type = #tpu.core_type<tc>, window_params = [{transform_indices = @transform_0, window_bounds = array<i64: 24, 128>}, {transform_indices = @transform_1, window_bounds = array<i64: 24, 128>}, {transform_indices = @transform_2, window_bounds = array<i64: 8, 128>}]} {
    %c0 = arith.constant 0 : index
    %c0_0 = arith.constant 0 : index
    %0 = vector.load %arg1[%c0, %c0_0] : memref<24x128xf32, #tpu.memory_space<vmem>>, vector<24x128xf32>
    %c0_1 = arith.constant 0 : index
    %c0_2 = arith.constant 0 : index
    %1 = vector.load %arg2[%c0_1, %c0_2] : memref<24x128xf32, #tpu.memory_space<vmem>>, vector<24x128xf32>
    %cst = arith.constant dense<0xFF800000> : vector<24xf32>
    %2 = vector.multi_reduction <maximumf>, %0, %cst [1] : vector<24x128xf32> to vector<24xf32>
    %3 = vector.shape_cast %2 : vector<24xf32> to vector<24x1xf32>
    %4 = vector.broadcast %3 : vector<24x1xf32> to vector<24x128xf32>
    %5 = arith.subf %0, %4 : vector<24x128xf32>
    %6 = math.exp %5 : vector<24x128xf32>
    %cst_3 = arith.constant dense<0.000000e+00> : vector<24xf32>
    %7 = vector.multi_reduction <add>, %6, %cst_3 [1] : vector<24x128xf32> to vector<24xf32>
    %8 = vector.shape_cast %7 : vector<24xf32> to vector<24x1xf32>
    %9 = math.log %8 : vector<24x1xf32>
    %cst_4 = arith.constant dense<0xFF800000> : vector<24xf32>
    %10 = vector.multi_reduction <maximumf>, %1, %cst_4 [1] : vector<24x128xf32> to vector<24xf32>
    %11 = vector.shape_cast %10 : vector<24xf32> to vector<24x1xf32>
    %12 = vector.broadcast %11 : vector<24x1xf32> to vector<24x128xf32>
    %13 = arith.subf %1, %12 : vector<24x128xf32>
    %14 = math.exp %13 : vector<24x128xf32>
    %cst_5 = arith.constant dense<0.000000e+00> : vector<24xf32>
    %15 = vector.multi_reduction <add>, %14, %cst_5 [1] : vector<24x128xf32> to vector<24xf32>
    %16 = vector.shape_cast %15 : vector<24xf32> to vector<24x1xf32>
    %17 = math.log %16 : vector<24x1xf32>
    %18 = tpu.reciprocal %16 {approx = true} : vector<24x1xf32> -> vector<24x1xf32>
    %19 = arith.mulf %16, %18 : vector<24x1xf32>
    %cst_6 = arith.constant 2.000000e+00 : f32
    %20 = vector.broadcast %cst_6 : f32 to vector<24x1xf32>
    %21 = arith.subf %20, %19 : vector<24x1xf32>
    %22 = arith.mulf %18, %21 : vector<24x1xf32>
    %23 = arith.subf %13, %5 : vector<24x128xf32>
    %24 = arith.mulf %14, %23 : vector<24x128xf32>
    %cst_7 = arith.constant dense<0.000000e+00> : vector<24xf32>
    %25 = vector.multi_reduction <add>, %24, %cst_7 [1] : vector<24x128xf32> to vector<24xf32>
    %26 = vector.shape_cast %25 : vector<24xf32> to vector<24x1xf32>
    %27 = arith.mulf %22, %26 : vector<24x1xf32>
    %28 = arith.subf %9, %17 : vector<24x1xf32>
    %29 = arith.addf %27, %28 : vector<24x1xf32>
    %c24_i32 = arith.constant 24 : i32
    %30 = arith.muli %arg0, %c24_i32 : i32
    %31 = tpu.iota {dimensions = array<i32: 0>} : vector<24x1xi32>
    %32 = vector.broadcast %30 : i32 to vector<24x1xi32>
    %33 = arith.addi %32, %31 : vector<24x1xi32>
    %c20_i32 = arith.constant 20 : i32
    %34 = vector.broadcast %c20_i32 : i32 to vector<24x1xi32>
    %35 = arith.cmpi slt, %33, %34 : vector<24x1xi32>
    %cst_8 = arith.constant 0.000000e+00 : f32
    %36 = vector.broadcast %cst_8 : f32 to vector<24x1xf32>
    %37 = arith.select %35, %29, %36 : vector<24x1xi1>, vector<24x1xf32>
    %38 = vector.shape_cast %37 : vector<24x1xf32> to vector<1x24x1xf32>
    %cst_9 = arith.constant dense<0.000000e+00> : vector<1xf32>
    %39 = vector.multi_reduction <add>, %38, %cst_9 [1, 2] : vector<1x24x1xf32> to vector<1xf32>
    %40 = vector.shape_cast %39 : vector<1xf32> to vector<1x1x1xf32>
    %41 = vector.extract %40[0, 0, 0] : f32 from vector<1x1x1xf32>
    %42 = vector.broadcast %41 : f32 to vector<8x128xf32>
    %c0_10 = arith.constant 0 : index
    %c0_11 = arith.constant 0 : index
    %43 = vector.load %arg3[%c0_10, %c0_11] : memref<8x128xf32, #tpu.memory_space<vmem>>, vector<8x128xf32>
    tpu.vector_store %arg3[%c0_10, %c0_11], %42 {strides = array<i32>} : memref<8x128xf32, #tpu.memory_space<vmem>>, vector<8x128xf32>,
    return
  }
  func.func @transform_0(%arg0: i32) -> (i32, i32) {
    %c0_i32 = arith.constant 0 : i32
    %c0_i32_0 = arith.constant 0 : i32
    return %arg0, %c0_i32 : i32, i32
  }
  func.func @transform_1(%arg0: i32) -> (i32, i32) {
    %c0_i32 = arith.constant 0 : i32
    %c0_i32_0 = arith.constant 0 : i32
    return %arg0, %c0_i32 : i32, i32
  }
  func.func @transform_2(%arg0: i32) -> (i32, i32) {
    %c0_i32 = arith.constant 0 : i32
    %c0_i32_0 = arith.constant 0 : i32
    return %c0_i32, %arg0 : i32, i32
  }
}

</mosaic_0001>

<bundles_post_ra>
// kernel: tpu_custom_call.1
= control target key start
LH: loop header
LB: loop body
LE: loop exit
PB: predicated region body
PF: predicated region fallthrough
CT: control target
= control target key end

     0   :  { %7 = vsyncpa [#allocation3], 0  ;;  %s313_s0 = inlined_call_operand.hbm [shape: f32[20,128], index: 0, kind: input, shape index: {}]   ;;  %s314_s1 = inlined_call_operand.hbm [shape: f32[20,128], index: 1, kind: input, shape index: {}]   ;;  %s315_s2 = inlined_call_operand.hbm [shape: f32[8,128], index: 2, kind: output, shape index: {}]  }
   0x1   :  { %8 = vsyncpa [#allocation6], 0 }
   0x2   :  { %9 = vsyncpa [#allocation4], 0  ;;  %s284_s9 = smov [#allocation2]  }
   0x3   :  { %s15_s10 = sshll.u32 %s284_s9, 4  ;;  %s16_s10 = int_to_ptr.vmem [resolvable:$true] %s15_s10 }
   0x4   :  { %s226_s11 = scalar_lea.vmem %s16_s10, 384  ;;  %p231_p1 = scmp.lt.s32.totalorder %s16_s10, %s16_s10 }
   0x5   :  { %p227_p0 = scmp.ne.s32.totalorder %s16_s10, %s226_s11  ;;  %p232_p2 = scmp.lt.s32.totalorder %s226_s11, %s226_s11 }
   0x7   :  { %p233_p3 = por %p232_p2, %p231_p1 }
   0x9   :  { %p234_p4 = pnand %p233_p3, %p227_p0 }
   0xb   :  { %237 = shalt.err (!%p234_p4)
}
   0xc   :  { %s285_s12 = smov 128   ;;  %s286_s13 = smov 8  }
   0xd   :  { %21 = dma.hbm_to_vmem [thread:$0]  %s313_s0, 384, %s16_s10, [#allocation3], %s285_s12, %s285_s12, %s286_s13  }
   0xe   :  { %s287_s16 = smov [#allocation5]  }
   0xf   :  { %s27_s17 = sshll.u32 %s287_s16, 4  ;;  %s28_s17 = int_to_ptr.vmem [resolvable:$true] %s27_s17 }
  0x10   :  { %s246_s18 = scalar_lea.vmem %s28_s17, 384  ;;  %p251_p6 = scmp.lt.s32.totalorder %s28_s17, %s28_s17 }
  0x11   :  { %p247_p5 = scmp.ne.s32.totalorder %s28_s17, %s246_s18  ;;  %p252_p7 = scmp.lt.s32.totalorder %s246_s18, %s246_s18 }
  0x13   :  { %p253_p8 = por %p252_p7, %p251_p6 }
  0x15   :  { %p254_p9 = pnand %p253_p8, %p247_p5 }
  0x17   :  { %257 = shalt.err (!%p254_p9)
}
  0x18   :  { %33 = dma.hbm_to_vmem [thread:$0]  %s314_s1, 384, %s28_s17, [#allocation6], %s285_s12, %s285_s12, %s286_s13  }
  0x19   :  { %278 = dma.done.wait [#allocation3], 384  }
  0x1a   :  { %279 = vsyncadd [#allocation3], 4294966912 }
  0x1b   :  { %280 = dma.done.wait [#allocation6], 384  }
  0x1c   :  { %281 = vsyncadd [#allocation6], 4294966912  ;;  %v45_v0 = vld [vmem:[#allocation5 + $0x10] sm:$0xff]  ;;  %v43_v1 = vld [vmem:[#allocation5] sm:$0xff]  ;;  %v134_v45 = vlaneseq  ;;  %vm148_vm0 = vcmask 7168   ;;  %s288_s0 = smov [#allocation7]  }
  0x1d   :  { %77 = vmax.xlane.f32.xlu1 %v45_v0  ;;  %73 = vmax.xlane.f32.xlu0 %v43_v1  ;;  %v44_v2 = vld [vmem:[#allocation5 + $0x8] sm:$0xff]  ;;  %v41_v4 = vld [vmem:[#allocation2 + $0x8] sm:$0xff]  ;;  %v42_v5 = vld [vmem:[#allocation2 + $0x10] sm:$0xff]  ;;  %s171_s1 = sshll.u32 %s288_s0, 4  ;;  %s172_s1 = int_to_ptr.vmem [resolvable:$true] %s171_s1 }
  0x1e   :  { %v40_v3 = vld [vmem:[#allocation2] sm:$0xff]  ;;  %v135_v55 = vshrl.u32 %v134_v45, 7  ;;  %s258_s22 = scalar_lea.vmem %s172_s1, 128  ;;  %p263_p11 = scmp.lt.s32.totalorder %s172_s1, %s172_s1 }
  0x1f   :  { %p259_p10 = scmp.ne.s32.totalorder %s172_s1, %s258_s22  ;;  %p264_p12 = scmp.lt.s32.totalorder %s258_s22, %s258_s22 }
  0x21   :  { %75 = vmax.xlane.f32.xlu0 %v44_v2  ;;  %46 = vmax.xlane.f32.xlu1 %v40_v3  ;;  %p265_p13 = por %p264_p12, %p263_p11 }
  0x23   :  { %p266_p0 = pnand %p265_p13, %p259_p10 }
  0x25   :  { %48 = vmax.xlane.f32.xlu0 %v41_v4  ;;  %50 = vmax.xlane.f32.xlu1 %v42_v5 }
  0xa6   :  { %v78_v6 = vpop.xlane.xlu1 %77  ;;  %v74_v7 = vpop.xlane.xlu0 %73 }
  0xa7   :  { %v79_v8 = vsub.f32 %v43_v1, %v74_v7  ;;  %v81_v9 = vsub.f32 %v45_v0, %v78_v6  ;;  %v137_v6 = vadd.s32 16, %v135_v55 }
  0xa9   :  { %v82_v10 = vmul.f32 1.442695, %v79_v8  ;;  %v86_v15 = vmul.f32 1.442695, %v81_v9  ;;  %vm144_vm1 = vcmp.lt.s32.totalorder %v137_v6, 20 }
  0xaa   :  { %v76_v11 = vpop.xlane.xlu0 %75  ;;  %v47_v12 = vpop.xlane.xlu1 %46 }
  0xab   :  { %v80_v13 = vsub.f32 %v44_v2, %v76_v11  ;;  %v52_v14 = vsub.f32 %v40_v3, %v47_v12  ;;  %188 = vpow2.f32 %v82_v10 }
  0xad   :  { %v84_v16 = vmul.f32 1.442695, %v80_v13  ;;  %v55_v17 = vmul.f32 1.442695, %v52_v14  ;;  %v112_v30 = vsub.f32 %v79_v8, %v52_v14 }
  0xae   :  { %v49_v18 = vpop.xlane.xlu0 %48  ;;  %v51_v19 = vpop.xlane.xlu1 %50 }
  0xaf   :  { %190 = vpow2.f32 %v84_v16  ;;  %v53_v20 = vsub.f32 %v41_v4, %v49_v18  ;;  %v54_v21 = vsub.f32 %v42_v5, %v51_v19 }
  0xb0   :  { %192 = vpow2.f32 %v86_v15 }
  0xb1   :  { %194 = vpow2.f32 %v55_v17  ;;  %v57_v22 = vmul.f32 1.442695, %v53_v20  ;;  %v59_v23 = vmul.f32 1.442695, %v54_v21  ;;  %v113_v32 = vsub.f32 %v80_v13, %v53_v20 }
  0xb2   :  { %v114_v33 = vsub.f32 %v81_v9, %v54_v21 }
  0xb3   :  { %196 = vpow2.f32 %v57_v22 }
  0xb4   :  { %198 = vpow2.f32 %v59_v23 }
  0xb8   :  { %v189_v24 = vpop.eup %188 }
  0xb9   :  { %88 = vadd.xlane.f32.xlu0 %v189_v24  ;;  %v115_v31 = vmul.f32 %v189_v24, %v112_v30 }
  0xbc   :  { %v191_v25 = vpop.eup %190 }
  0xbd   :  { %v193_v26 = vpop.eup %192  ;;  %90 = vadd.xlane.f32.xlu1 %v191_v25  ;;  %v116_v34 = vmul.f32 %v191_v25, %v113_v32 }
  0xbe   :  { %v195_v27 = vpop.eup %194  ;;  %92 = vadd.xlane.f32.xlu0 %v193_v26  ;;  %v117_v35 = vmul.f32 %v193_v26, %v114_v33 }
  0xc0   :  { %v197_v28 = vpop.eup %196 }
  0xc1   :  { %61 = vadd.xlane.f32.xlu1 %v195_v27  ;;  %v199_v29 = vpop.eup %198 }
  0xc2   :  { %63 = vadd.xlane.f32.xlu0 %v197_v28 }
  0xc5   :  { %65 = vadd.xlane.f32.xlu1 %v199_v29 }
  0xc6   :  { %118 = vadd.xlane.f32.xlu0 %v115_v31 }
  0xc9   :  { %120 = vadd.xlane.f32.xlu1 %v116_v34 }
  0xca   :  { %122 = vadd.xlane.f32.xlu0 %v117_v35 }
 0x142   :  { %v89_v36 = vpop.xlane.xlu0 %88 }
 0x143   :  { %200 = vrcp.f32 %v89_v36 }
 0x144   :  { %202 = vlog2.f32 %v89_v36 }
 0x146   :  { %v91_v37 = vpop.xlane.xlu1 %90 }
 0x147   :  { %v93_v38 = vpop.xlane.xlu0 %92  ;;  %204 = vlog2.f32 %v91_v37 }
 0x148   :  { %206 = vrcp.f32 %v93_v38 }
 0x149   :  { %208 = vrcp.f32 %v91_v37 }
 0x14a   :  { %v62_v39 = vpop.xlane.xlu1 %61 }
 0x14b   :  { %v64_v40 = vpop.xlane.xlu0 %63  ;;  %210 = vlog2.f32 %v62_v39 }
 0x14c   :  { %212 = vlog2.f32 %v64_v40 }
 0x14d   :  { %214 = vlog2.f32 %v93_v38 }
 0x14e   :  { %v66_v41 = vpop.xlane.xlu1 %65 }
 0x14f   :  { %216 = vlog2.f32 %v66_v41  ;;  %v119_v54 = vpop.xlane.xlu0 %118 }
 0x150   :  { %v201_v42 = vpop.eup %200 }
 0x151   :  { %v103_v43 = vmul.f32 %v201_v42, %v89_v36  ;;  %v203_v44 = vpop.eup %202 }
 0x152   :  { %v95_v59 = vmul.f32 0.6931472, %v203_v44  ;;  %v121_v10 = vpop.xlane.xlu1 %120 }
 0x153   :  { %v106_v47 = vsub.f32 2.0, %v103_v43  ;;  %v123_v11 = vpop.xlane.xlu0 %122 }
 0x154   :  { %v205_v46 = vpop.eup %204 }
 0x155   :  { %v207_v48 = vpop.eup %206  ;;  %v109_v51 = vmul.f32 %v201_v42, %v106_v47  ;;  %v97_v63 = vmul.f32 0.6931472, %v205_v46 }
 0x156   :  { %v209_v49 = vpop.eup %208  ;;  %v105_v50 = vmul.f32 %v207_v48, %v93_v38 }
 0x157   :  { %v104_v53 = vmul.f32 %v209_v49, %v91_v37  ;;  %v124_v0 = vmul.f32 %v119_v54, %v109_v51 }
 0x158   :  { %v211_v52 = vpop.eup %210  ;;  %v108_v57 = vsub.f32 2.0, %v105_v50 }
 0x159   :  { %v213_v56 = vpop.eup %212  ;;  %v68_v58 = vmul.f32 0.6931472, %v211_v52  ;;  %v107_v61 = vsub.f32 2.0, %v104_v53 }
 0x15a   :  { %v215_v60 = vpop.eup %214  ;;  %v70_v62 = vmul.f32 0.6931472, %v213_v56  ;;  %v111_v2 = vmul.f32 %v207_v48, %v108_v57 }
 0x15b   :  { %v127_v1 = vsub.f32 %v68_v58, %v95_v59  ;;  %v110_v4 = vmul.f32 %v209_v49, %v107_v61  ;;  %v99_v9 = vmul.f32 0.6931472, %v215_v60 }
 0x15c   :  { %v217_v3 = vpop.eup %216  ;;  %v128_v5 = vsub.f32 %v70_v62, %v97_v63  ;;  %v126_v13 = vmul.f32 %v123_v11, %v111_v2 }
 0x15d   :  { %v130_v7 = vadd.f32 %v127_v1, %v124_v0  ;;  %v72_v8 = vmul.f32 0.6931472, %v217_v3  ;;  %v125_v12 = vmul.f32 %v121_v10, %v110_v4 }
 0x15f   :  { %v129_v14 = vsub.f32 %v72_v8, %v99_v9  ;;  %v131_v15 = vadd.f32 %v128_v5, %v125_v12  ;;  %v149_v16 = vsel %vm148_vm0, %v130_v7, 0.0 }
 0x161   :  { %v132_v17 = vadd.f32 %v129_v14, %v126_v13  ;;  %v150_v18 = vsel %vm148_vm0, %v131_v15, 0.0 }
 0x162   :  { %v151_v20 = vadd.f32 %v150_v18, %v149_v16 }
 0x163   :  { %v147_v19 = vsel %vm144_vm1, %v132_v17, 0.0 }
 0x164   :  { %v152_v21 = vsel %vm148_vm0, %v147_v19, 0.0 }
 0x165   :  { %v153_v22 = vadd.f32 %v152_v21, %v151_v20 }
 0x167   :  { %154 = vadd.xlane.f32.xlu1 %v153_v22 }
 0x1f0   :  { %v155_v23 = vpop.xlane.xlu1 %154 }
 0x1f1   :  { %v156_v24 = vrot.slane %v155_v23, 4 }
 0x1f3   :  { %v157_v25 = vadd.f32 %v156_v24, %v155_v23 }
 0x1f5   :  { %v158_v26 = vrot.slane %v157_v25, 2 }
 0x1f7   :  { %v159_v27 = vadd.f32 %v158_v26, %v157_v25 }
 0x1f9   :  { %v160_v28 = vrot.slane %v159_v27, 1 }
 0x1fb   :  { %v161_v29 = vadd.f32 %v160_v28, %v159_v27 }
 0x1fd   :  { %181 = vpush %v161_v29 }
 0x22e   :  { %s182_s21 = spop %181 }
 0x22f   :  { %v163_v30 = vstv %s182_s21 }
 0x230   :  { %164 = vst [vmem:[#allocation7] sm:$0xff] %v163_v30 }
 0x231   :  { %269 = shalt.err (!%p266_p0)
}
 0x232   :  { %174 = dma.vmem_to_hbm [thread:$0]  %s172_s1, 128, %s315_s2, [#allocation4]  }
 0x233   :  { %282 = dma.done.wait [#allocation4], 128  }
 0x234   :  { %283 = vsyncadd [#allocation4], 4294967168 }
 0x235   :  { %178 = vsyncpa [#allocation3], 1 }
 0x236   :  { %179 = vsyncpa [#allocation6], 1 }
 0x237   :  { %180 = vsyncpa [#allocation4], 1 }

</bundles_post_ra>
